<compile_context>
chip_gen: v5e
topology: v5e:2x2
jax: 0.10.0
libtpu: 0.0.40
codegen_flags: <defaults>
</compile_context>

<pallas_src>
import functools

import jax
import jax.numpy as jnp
from jax.experimental import pallas as pl
from jax.experimental.pallas import tpu as pltpu


# ------------------------------- helpers ----------------------------------- #

def _pick_cout_tile(cout, cin, max_weight_bytes=8 << 20):
    """Full Cout (resident weight) when the bf16 weight fits; else 128-aligned split."""
    if 9 * cin * cout * 2 <= max_weight_bytes or cout % 128 != 0:
        return cout
    for tn in (512, 384, 256, 128):
        if cout % tn == 0:
            return tn
    return cout


# ----------------------------- Pallas kernel ------------------------------- #

def _conv3x3s2_kernel(x_ref, w_ref, o_ref, *, ho, wo):
    """One (image, Cout-tile) step of the stride-2 3x3 conv.

    x_ref: (4, Ho+1, Wo+1, C) bf16 space-to-depth phases of the zero-padded
           image; phase p = 2*rh + rw holds xp[2*i + rh, 2*j + rw, :].
    w_ref: (9, C, tn) bf16 per-tap weights (tap = 3*kh + kw).
    o_ref: (Ho*Wo, tn) output tile (lane dim = Cout tile).
    """
    c = x_ref.shape[-1]
    # Load the four phases once; every tap below is a unit-stride value slice.
    phases = [x_ref[p] for p in range(4)]          # each (Ho+1, Wo+1, C)

    acc = None
    for kh in range(3):
        ph, rh = divmod(kh, 2)                     # kh = 2*ph + rh
        for kw in range(3):
            pw, rw = divmod(kw, 2)                 # kw = 2*pw + rw
            slab = phases[2 * rh + rw][ph:ph + ho, pw:pw + wo, :]   # (Ho, Wo, C)
            a = slab.reshape(ho * wo, c)
            part = jnp.dot(a, w_ref[3 * kh + kw],
                           preferred_element_type=jnp.float32)      # (Ho*Wo, tn)
            acc = part if acc is None else acc + part
    o_ref[...] = acc.astype(o_ref.dtype)


# ------------------------------- Module glue ------------------------------- #

def downsample_forward(x_nchw, weight, *, out_dtype=None, channels_last_out=False):
    """Conv2d(C, Cout, 3, stride=2, padding=1, bias=False).

    x_nchw : (N, C, H, W)            weight : (Cout, C, 3, 3)  (PyTorch OIHW)
    returns: (N, Cout, Ho, Wo)  (or (N, Ho, Wo, Cout) if channels_last_out)
    out_dtype defaults to x_nchw.dtype; pass jnp.bfloat16 for bf16 pipelines.
    """
    N, C, H, W = x_nchw.shape
    Cout = weight.shape[0]
    Ho = (H - 1) // 2 + 1
    Wo = (W - 1) // 2 + 1
    Hp, Wp = Ho + 1, Wo + 1
    if out_dtype is None:
        out_dtype = x_nchw.dtype
    out_itemsize = jnp.dtype(out_dtype).itemsize

    # --- single fused pass: cast bf16 -> pad(1) -> space-to-depth phases ----
    xb = x_nchw.astype(jnp.bfloat16)
    xp = jnp.pad(xb, ((0, 0), (0, 0), (1, 2 * Hp - H - 1), (1, 2 * Wp - W - 1)))
    # (N, C, 2Hp, 2Wp) -> (N, rh, rw, Hp, Wp, C) -> (N, 4, Hp, Wp, C)
    phases = xp.reshape(N, C, Hp, 2, Wp, 2)
    phases = jnp.transpose(phases, (0, 3, 5, 2, 4, 1)).reshape(N, 4, Hp, Wp, C)

    # --- weights: OIHW -> (tap=3*kh+kw, C, Cout), bf16 (tiny, one-time) -----
    wmat = jnp.transpose(weight, (2, 3, 1, 0)).reshape(9, C, Cout)
    wmat = wmat.astype(jnp.bfloat16)

    # --- Cout tiling: weight stays resident whenever it fits ----------------
    tn = _pick_cout_tile(Cout, C)
    num_j = Cout // tn

    # --- VMEM estimate; raise the scoped limit only when actually needed ----
    est = (2 * (4 * Hp * Wp * C * 2            # phases block (double-buffered)
                + 9 * C * tn * 2               # weight block
                + Ho * Wo * tn * out_itemsize) # output block
           + Ho * Wo * tn * 4                  # f32 accumulator
           + 2 * Ho * Wo * C * 2)              # slab working copies
    compiler_kwargs = {}
    if est > 12 * 1024 * 1024:
        compiler_kwargs["vmem_limit_bytes"] = int(min(64 << 20, max(32 << 20, 2 * est)))

    cost = pl.CostEstimate(
        flops=2 * N * Ho * Wo * 9 * C * Cout,
        transcendentals=0,
        bytes_accessed=(num_j * phases.size * 2      # phases re-read once per Cout tile
                        + wmat.size * 2              # each weight tile read once
                        + N * Ho * Wo * Cout * out_itemsize),
    )

    kernel = functools.partial(_conv3x3s2_kernel, ho=Ho, wo=Wo)
    out = pl.pallas_call(
        kernel,
        out_shape=jax.ShapeDtypeStruct((N, Ho * Wo, Cout), out_dtype),
        grid_spec=pltpu.PrefetchScalarGridSpec(
            num_scalar_prefetch=0,
            grid=(num_j, N),   # j slow: weight tile stays resident across the batch
            in_specs=[
                pl.BlockSpec((None, 4, Hp, Wp, C), lambda j, n: (n, 0, 0, 0, 0)),
                pl.BlockSpec((9, C, tn), lambda j, n: (0, 0, j)),
            ],
            out_specs=pl.BlockSpec((None, Ho * Wo, tn), lambda j, n: (n, 0, j)),
        ),
        compiler_params=pltpu.CompilerParams(
            dimension_semantics=("parallel", "parallel"),  # batch axis feeds v7x's 2 TCs
            **compiler_kwargs),
        cost_estimate=cost,
    )(phases, wmat)

    out = out.reshape(N, Ho, Wo, Cout)        # metadata-only reshape (row-major)
    if channels_last_out:
        return out                            # NHWC: no output transpose pass
    return jnp.transpose(out, (0, 3, 1, 2))   # NCHW demanded by the PyTorch interface


# ---------------------------------- main ------------------------------------ #

if __name__ == "__main__":
    key = jax.random.PRNGKey(0)
    kx, kw = jax.random.split(key)

    # Downsample(dim=4, keep_dim=False, reduce=False) -> dim_out = 2 * dim = 8
    dim, dim_out = 4, 8
    N, H, W = 2, 16, 16

    x = jax.random.normal(kx, (N, dim, H, W), dtype=jnp.float32)
    # Deterministic synthetic weights (Conv2d weight shape: (Cout, Cin, 3, 3)).
    weight = 0.1 * jax.random.normal(kw, (dim_out, dim, 3, 3), dtype=jnp.float32)

    fwd = jax.jit(downsample_forward)
    y = jax.block_until_ready(fwd(x, weight))

    # Cross-check against XLA's conv (f32 reference; bf16 operands => ~1e-2 tol).
    ref = jax.lax.conv_general_dilated(
        x, weight, window_strides=(2, 2), padding=((1, 1), (1, 1)),
        dimension_numbers=("NCHW", "OIHW", "NCHW"))
    ref = jax.block_until_ready(ref)

    assert y.shape == (N, dim_out, H // 2, W // 2), y.shape
    max_err = float(jnp.max(jnp.abs(y - ref)))
    assert jnp.allclose(y, ref, atol=5e-2, rtol=5e-2), (
        f"mismatch vs reference conv (max abs err {max_err})")

    print("KERNEL_OK")
</pallas_src>

<mosaic_0001>
module attributes {stable_mosaic.version = 11 : i64} {
  func.func @_conv3x3s2_kernel(%arg0: i32, %arg1: i32, %arg2: memref<1x4x9x9x4xbf16, #tpu.memory_space<vmem>>, %arg3: memref<9x4x8xbf16, #tpu.memory_space<vmem>>, %arg4: memref<1x64x8xf32, #tpu.memory_space<vmem>>) attributes {dimension_semantics = [#tpu.dimension_semantics<parallel>, #tpu.dimension_semantics<parallel>], iteration_bounds = array<i64: 1, 2>, scalar_prefetch = 0 : i64, scratch_operands = 0 : i64, tpu.core_type = #tpu.core_type<tc>, window_params = [{transform_indices = @transform_0, window_bounds = array<i64: 1, 4, 9, 9, 4>}, {transform_indices = @transform_1, window_bounds = array<i64: 9, 4, 8>}, {transform_indices = @transform_2, window_bounds = array<i64: 1, 64, 8>}]} {
    %c0 = arith.constant 0 : index
    %c0_0 = arith.constant 0 : index
    %c0_1 = arith.constant 0 : index
    %c0_2 = arith.constant 0 : index
    %c0_3 = arith.constant 0 : index
    %0 = vector.load %arg2[%c0, %c0_0, %c0_1, %c0_2, %c0_3] : memref<1x4x9x9x4xbf16, #tpu.memory_space<vmem>>, vector<1x1x9x9x4xbf16>
    %1 = vector.shape_cast %0 : vector<1x1x9x9x4xbf16> to vector<9x9x4xbf16>
    %c0_4 = arith.constant 0 : index
    %c1 = arith.constant 1 : index
    %c0_5 = arith.constant 0 : index
    %c0_6 = arith.constant 0 : index
    %c0_7 = arith.constant 0 : index
    %2 = vector.load %arg2[%c0_4, %c1, %c0_5, %c0_6, %c0_7] : memref<1x4x9x9x4xbf16, #tpu.memory_space<vmem>>, vector<1x1x9x9x4xbf16>
    %3 = vector.shape_cast %2 : vector<1x1x9x9x4xbf16> to vector<9x9x4xbf16>
    %c0_8 = arith.constant 0 : index
    %c2 = arith.constant 2 : index
    %c0_9 = arith.constant 0 : index
    %c0_10 = arith.constant 0 : index
    %c0_11 = arith.constant 0 : index
    %4 = vector.load %arg2[%c0_8, %c2, %c0_9, %c0_10, %c0_11] : memref<1x4x9x9x4xbf16, #tpu.memory_space<vmem>>, vector<1x1x9x9x4xbf16>
    %5 = vector.shape_cast %4 : vector<1x1x9x9x4xbf16> to vector<9x9x4xbf16>
    %c0_12 = arith.constant 0 : index
    %c3 = arith.constant 3 : index
    %c0_13 = arith.constant 0 : index
    %c0_14 = arith.constant 0 : index
    %c0_15 = arith.constant 0 : index
    %6 = vector.load %arg2[%c0_12, %c3, %c0_13, %c0_14, %c0_15] : memref<1x4x9x9x4xbf16, #tpu.memory_space<vmem>>, vector<1x1x9x9x4xbf16>
    %7 = vector.shape_cast %6 : vector<1x1x9x9x4xbf16> to vector<9x9x4xbf16>
    %8 = vector.extract_strided_slice %1 {offsets = [0, 0, 0], sizes = [8, 8, 4], strides = [1, 1, 1]} : vector<9x9x4xbf16> to vector<8x8x4xbf16>
    %9 = vector.shape_cast %8 : vector<8x8x4xbf16> to vector<64x4xbf16>
    %c0_16 = arith.constant 0 : index
    %c0_17 = arith.constant 0 : index
    %c0_18 = arith.constant 0 : index
    %10 = vector.load %arg3[%c0_16, %c0_17, %c0_18] : memref<9x4x8xbf16, #tpu.memory_space<vmem>>, vector<1x4x8xbf16>
    %11 = vector.shape_cast %10 : vector<1x4x8xbf16> to vector<4x8xbf16>
    %cst = arith.constant dense<0.000000e+00> : vector<64x8xf32>
    %12 = tpu.matmul %9, %11, %cst {dimension_numbers = #tpu.dot_dimension_numbers<[1], [0], [0], [1], [0, 0, 1, 1], [], []>} : vector<64x4xbf16>, vector<4x8xbf16>, vector<64x8xf32> -> vector<64x8xf32>
    %13 = vector.extract_strided_slice %3 {offsets = [0, 0, 0], sizes = [8, 8, 4], strides = [1, 1, 1]} : vector<9x9x4xbf16> to vector<8x8x4xbf16>
    %14 = vector.shape_cast %13 : vector<8x8x4xbf16> to vector<64x4xbf16>
    %c1_19 = arith.constant 1 : index
    %c0_20 = arith.constant 0 : index
    %c0_21 = arith.constant 0 : index
    %15 = vector.load %arg3[%c1_19, %c0_20, %c0_21] : memref<9x4x8xbf16, #tpu.memory_space<vmem>>, vector<1x4x8xbf16>
    %16 = vector.shape_cast %15 : vector<1x4x8xbf16> to vector<4x8xbf16>
    %cst_22 = arith.constant dense<0.000000e+00> : vector<64x8xf32>
    %17 = tpu.matmul %14, %16, %cst_22 {dimension_numbers = #tpu.dot_dimension_numbers<[1], [0], [0], [1], [0, 0, 1, 1], [], []>} : vector<64x4xbf16>, vector<4x8xbf16>, vector<64x8xf32> -> vector<64x8xf32>
    %18 = arith.addf %12, %17 : vector<64x8xf32>
    %19 = vector.extract_strided_slice %1 {offsets = [0, 1, 0], sizes = [8, 8, 4], strides = [1, 1, 1]} : vector<9x9x4xbf16> to vector<8x8x4xbf16>
    %20 = vector.shape_cast %19 : vector<8x8x4xbf16> to vector<64x4xbf16>
    %c2_23 = arith.constant 2 : index
    %c0_24 = arith.constant 0 : index
    %c0_25 = arith.constant 0 : index
    %21 = vector.load %arg3[%c2_23, %c0_24, %c0_25] : memref<9x4x8xbf16, #tpu.memory_space<vmem>>, vector<1x4x8xbf16>
    %22 = vector.shape_cast %21 : vector<1x4x8xbf16> to vector<4x8xbf16>
    %cst_26 = arith.constant dense<0.000000e+00> : vector<64x8xf32>
    %23 = tpu.matmul %20, %22, %cst_26 {dimension_numbers = #tpu.dot_dimension_numbers<[1], [0], [0], [1], [0, 0, 1, 1], [], []>} : vector<64x4xbf16>, vector<4x8xbf16>, vector<64x8xf32> -> vector<64x8xf32>
    %24 = arith.addf %18, %23 : vector<64x8xf32>
    %25 = vector.extract_strided_slice %5 {offsets = [0, 0, 0], sizes = [8, 8, 4], strides = [1, 1, 1]} : vector<9x9x4xbf16> to vector<8x8x4xbf16>
    %26 = vector.shape_cast %25 : vector<8x8x4xbf16> to vector<64x4xbf16>
    %c3_27 = arith.constant 3 : index
    %c0_28 = arith.constant 0 : index
    %c0_29 = arith.constant 0 : index
    %27 = vector.load %arg3[%c3_27, %c0_28, %c0_29] : memref<9x4x8xbf16, #tpu.memory_space<vmem>>, vector<1x4x8xbf16>
    %28 = vector.shape_cast %27 : vector<1x4x8xbf16> to vector<4x8xbf16>
    %cst_30 = arith.constant dense<0.000000e+00> : vector<64x8xf32>
    %29 = tpu.matmul %26, %28, %cst_30 {dimension_numbers = #tpu.dot_dimension_numbers<[1], [0], [0], [1], [0, 0, 1, 1], [], []>} : vector<64x4xbf16>, vector<4x8xbf16>, vector<64x8xf32> -> vector<64x8xf32>
    %30 = arith.addf %24, %29 : vector<64x8xf32>
    %31 = vector.extract_strided_slice %7 {offsets = [0, 0, 0], sizes = [8, 8, 4], strides = [1, 1, 1]} : vector<9x9x4xbf16> to vector<8x8x4xbf16>
    %32 = vector.shape_cast %31 : vector<8x8x4xbf16> to vector<64x4xbf16>
    %c4 = arith.constant 4 : index
    %c0_31 = arith.constant 0 : index
    %c0_32 = arith.constant 0 : index
    %33 = vector.load %arg3[%c4, %c0_31, %c0_32] : memref<9x4x8xbf16, #tpu.memory_space<vmem>>, vector<1x4x8xbf16>
    %34 = vector.shape_cast %33 : vector<1x4x8xbf16> to vector<4x8xbf16>
    %cst_33 = arith.constant dense<0.000000e+00> : vector<64x8xf32>
    %35 = tpu.matmul %32, %34, %cst_33 {dimension_numbers = #tpu.dot_dimension_numbers<[1], [0], [0], [1], [0, 0, 1, 1], [], []>} : vector<64x4xbf16>, vector<4x8xbf16>, vector<64x8xf32> -> vector<64x8xf32>
    %36 = arith.addf %30, %35 : vector<64x8xf32>
    %37 = vector.extract_strided_slice %5 {offsets = [0, 1, 0], sizes = [8, 8, 4], strides = [1, 1, 1]} : vector<9x9x4xbf16> to vector<8x8x4xbf16>
    %38 = vector.shape_cast %37 : vector<8x8x4xbf16> to vector<64x4xbf16>
    %c5 = arith.constant 5 : index
    %c0_34 = arith.constant 0 : index
    %c0_35 = arith.constant 0 : index
    %39 = vector.load %arg3[%c5, %c0_34, %c0_35] : memref<9x4x8xbf16, #tpu.memory_space<vmem>>, vector<1x4x8xbf16>
    %40 = vector.shape_cast %39 : vector<1x4x8xbf16> to vector<4x8xbf16>
    %cst_36 = arith.constant dense<0.000000e+00> : vector<64x8xf32>
    %41 = tpu.matmul %38, %40, %cst_36 {dimension_numbers = #tpu.dot_dimension_numbers<[1], [0], [0], [1], [0, 0, 1, 1], [], []>} : vector<64x4xbf16>, vector<4x8xbf16>, vector<64x8xf32> -> vector<64x8xf32>
    %42 = arith.addf %36, %41 : vector<64x8xf32>
    %43 = vector.extract_strided_slice %1 {offsets = [1, 0, 0], sizes = [8, 8, 4], strides = [1, 1, 1]} : vector<9x9x4xbf16> to vector<8x8x4xbf16>
    %44 = vector.shape_cast %43 : vector<8x8x4xbf16> to vector<64x4xbf16>
    %c6 = arith.constant 6 : index
    %c0_37 = arith.constant 0 : index
    %c0_38 = arith.constant 0 : index
    %45 = vector.load %arg3[%c6, %c0_37, %c0_38] : memref<9x4x8xbf16, #tpu.memory_space<vmem>>, vector<1x4x8xbf16>
    %46 = vector.shape_cast %45 : vector<1x4x8xbf16> to vector<4x8xbf16>
    %cst_39 = arith.constant dense<0.000000e+00> : vector<64x8xf32>
    %47 = tpu.matmul %44, %46, %cst_39 {dimension_numbers = #tpu.dot_dimension_numbers<[1], [0], [0], [1], [0, 0, 1, 1], [], []>} : vector<64x4xbf16>, vector<4x8xbf16>, vector<64x8xf32> -> vector<64x8xf32>
    %48 = arith.addf %42, %47 : vector<64x8xf32>
    %49 = vector.extract_strided_slice %3 {offsets = [1, 0, 0], sizes = [8, 8, 4], strides = [1, 1, 1]} : vector<9x9x4xbf16> to vector<8x8x4xbf16>
    %50 = vector.shape_cast %49 : vector<8x8x4xbf16> to vector<64x4xbf16>
    %c7 = arith.constant 7 : index
    %c0_40 = arith.constant 0 : index
    %c0_41 = arith.constant 0 : index
    %51 = vector.load %arg3[%c7, %c0_40, %c0_41] : memref<9x4x8xbf16, #tpu.memory_space<vmem>>, vector<1x4x8xbf16>
    %52 = vector.shape_cast %51 : vector<1x4x8xbf16> to vector<4x8xbf16>
    %cst_42 = arith.constant dense<0.000000e+00> : vector<64x8xf32>
    %53 = tpu.matmul %50, %52, %cst_42 {dimension_numbers = #tpu.dot_dimension_numbers<[1], [0], [0], [1], [0, 0, 1, 1], [], []>} : vector<64x4xbf16>, vector<4x8xbf16>, vector<64x8xf32> -> vector<64x8xf32>
    %54 = arith.addf %48, %53 : vector<64x8xf32>
    %55 = vector.extract_strided_slice %1 {offsets = [1, 1, 0], sizes = [8, 8, 4], strides = [1, 1, 1]} : vector<9x9x4xbf16> to vector<8x8x4xbf16>
    %56 = vector.shape_cast %55 : vector<8x8x4xbf16> to vector<64x4xbf16>
    %c8 = arith.constant 8 : index
    %c0_43 = arith.constant 0 : index
    %c0_44 = arith.constant 0 : index
    %57 = vector.load %arg3[%c8, %c0_43, %c0_44] : memref<9x4x8xbf16, #tpu.memory_space<vmem>>, vector<1x4x8xbf16>
    %58 = vector.shape_cast %57 : vector<1x4x8xbf16> to vector<4x8xbf16>
    %cst_45 = arith.constant dense<0.000000e+00> : vector<64x8xf32>
    %59 = tpu.matmul %56, %58, %cst_45 {dimension_numbers = #tpu.dot_dimension_numbers<[1], [0], [0], [1], [0, 0, 1, 1], [], []>} : vector<64x4xbf16>, vector<4x8xbf16>, vector<64x8xf32> -> vector<64x8xf32>
    %60 = arith.addf %54, %59 : vector<64x8xf32>
    %c0_46 = arith.constant 0 : index
    %c0_47 = arith.constant 0 : index
    %c0_48 = arith.constant 0 : index
    %61 = vector.load %arg4[%c0_46, %c0_47, %c0_48] : memref<1x64x8xf32, #tpu.memory_space<vmem>>, vector<1x64x8xf32>
    %62 = vector.shape_cast %61 : vector<1x64x8xf32> to vector<64x8xf32>
    %63 = vector.shape_cast %60 : vector<64x8xf32> to vector<1x64x8xf32>
    tpu.vector_store %arg4[%c0_46, %c0_47, %c0_48], %63 {strides = array<i32>} : memref<1x64x8xf32, #tpu.memory_space<vmem>>, vector<1x64x8xf32>,
    return
  }
  func.func @transform_0(%arg0: i32, %arg1: i32) -> (i32, i32, i32, i32, i32) {
    %c0_i32 = arith.constant 0 : i32
    %c0_i32_0 = arith.constant 0 : i32
    %c0_i32_1 = arith.constant 0 : i32
    %c0_i32_2 = arith.constant 0 : i32
    %c0_i32_3 = arith.constant 0 : i32
    return %arg1, %c0_i32, %c0_i32_0, %c0_i32_1, %c0_i32_2 : i32, i32, i32, i32, i32
  }
  func.func @transform_1(%arg0: i32, %arg1: i32) -> (i32, i32, i32) {
    %c0_i32 = arith.constant 0 : i32
    %c0_i32_0 = arith.constant 0 : i32
    %c0_i32_1 = arith.constant 0 : i32
    return %c0_i32, %c0_i32_0, %arg0 : i32, i32, i32
  }
  func.func @transform_2(%arg0: i32, %arg1: i32) -> (i32, i32, i32) {
    %c0_i32 = arith.constant 0 : i32
    %c0_i32_0 = arith.constant 0 : i32
    return %arg1, %c0_i32, %arg0 : i32, i32, i32
  }
}

</mosaic_0001>

<bundles_post_ra>
// kernel: downsample_forward.1
= control target key start
LH: loop header
LB: loop body
LE: loop exit
PB: predicated region body
PF: predicated region fallthrough
CT: control target
= control target key end

     0   :  { %s1367_s9 = smov 0   ;;  %s1369_s10 = smov 0   ;;  %s1789_s0 = inlined_call_operand.vmem [shape: bf16[2,4,9,9,4], index: 0, kind: input, shape index: {}]   ;;  %s1790_s1 = inlined_call_operand.vmem [shape: bf16[9,4,8], index: 1, kind: input, shape index: {}]   ;;  %s1791_s2 = inlined_call_operand.vmem [shape: f32[2,64,8], index: 2, kind: output, shape index: {}]  }
   0x1   :  { %s1371_s11 = smov 0  }
   0x2 LB: > { %s21_s12 = sadd.s32 1, %s1346_s10  ;;  %p1176_p0 = scmp.ge.s32.totalorder %s1350_s11, 1  ;;  %s1350_s11 = sphi %s1371_s11, %s12_s11   ;;  %s1346_s10 = sphi %s1369_s10, %s1795_s10   ;;  %s1342_s9 = sphi %s1367_s9, %s1794_s9  }
   0x3   : > { %p22_p1 = scmp.ge.s32.totalorder %s21_s12, 2  ;;  %p135_p2 = scmp.lt.s32.totalorder %s1350_s11, 3 }
   0x5   : > { %s1797_s12 = smov (%p22_p1, %s21_s12), 0  ;;  %p136_p3 = pnand %p1176_p0, %p135_p2 }
   0x6   : > { %p164_p4 = scmp.lt.s32.totalorder (!%p136_p3), %s1342_s9, 1 }
   0x7   : > { %139 = sbr.rel (%p136_p3) target bundleno = 298 (0x12a), region = 28 }
   0xc   : > { %v1213_v0 = vld [vmem:[%s1790_s1 + $0x2] sm:$0x3]  ;;  %vm272_vm0 = vcmask 1041408   ;;  %v1222_v2 = vld [vmem:[%s1790_s1 + $0x4] sm:$0x3]  ;;  %s1799_s9 = smov (!%p164_p4, %s1342_s9), 1 }
   0xd   : > { %v274_v1 = vsel %vm272_vm0, %v1213_v0, 0  ;;  %v1227_v3 = vld [vmem:[%s1790_s1 + $0x6] sm:$0x3]  ;;  %v511_v4 = vsel %vm272_vm0, %v1222_v2, 0  ;;  %v236_v6 = vld [vmem:[%s1790_s1] sm:$0x3] }
   0xe   : > { %1300 = vmatpush.bf16.msra.mxu1 %v274_v1  ;;  %1301 = vmatpush.bf16.msra.mxu2 %v274_v1  ;;  %v585_v5 = vsel %vm272_vm0, %v1227_v3, 0  ;;  %v338_v7 = vsel %vm272_vm0, %v236_v6, 0  ;;  %v1248_v8 = vld [vmem:[%s1790_s1 + $0x8] sm:$0x3]  ;;  %s1303_s23 = smul.u32 288, %s1799_s9  ;;  %vm259_vm1 = vcmask 31744  }
   0xf   : > { %1302 = vmatpush.bf16.msra.mxu3 %v274_v1  ;;  %283 = vmatpush.bf16.msra.mxu0 %v274_v1  ;;  %v659_v9 = vsel %vm272_vm0, %v1248_v8, 0  ;;  %v1274_v10 = vld [vmem:[%s1790_s1 + $0xc] sm:$0x3]  ;;  %vm369_vm2 = vsmask.f32 3328  ;;  %s1291_s7 = sshll.u32 %s1799_s9, 6 }
  0x10   : > { %s1414_s28 = scalar_lea.vmem %s1789_s0, %s1303_s23  ;;  %v897_v11 = vsel %vm272_vm0, %v1274_v10, 0  ;;  %v1279_v12 = vld [vmem:[%s1790_s1 + $0xe] sm:$0x3]  ;;  %v1269_v13 = vld [vmem:[%s1790_s1 + $0xa] sm:$0x3]  ;;  %s1742_s14 = scalar_lea.vmem %s1791_s2, %s1291_s7  ;;  %vm1069_vm5 = vcmask 64512  }
  0x11   : > { %v1182_v14 = vld [vmem:[%s1414_s28 + $0x58] sm:$0xf]  ;;  %v1425_v15 = vld [vmem:[%s1414_s28 + $0x60] sm:$0xf]  ;;  %v1428_v16 = vld [vmem:[%s1414_s28 + $0x68] sm:$0xf] }
  0x12   : > { %520 = vmatpush.bf16.msrb.mxu2 %v511_v4  ;;  %347 = vmatpush.bf16.msrb.mxu1 %v338_v7  ;;  %v249_v17 = vunpack.c.l.b16 %v1182_v14  ;;  %v250_v18 = vunpack.c.l.b16 %v1425_v15  ;;  %v1432_v19 = vld [vmem:[%s1414_s28 + $0x70] sm:$0xf]  ;;  %v251_v20 = vunpack.c.l.b16 %v1428_v16  ;;  %v1436_v21 = vld [vmem:[%s1414_s28 + $0x78] sm:$0xf]  ;;  %v1439_v22 = vld [vmem:[%s1414_s28 + $0x80] sm:$0xf] }
  0x13   : > { %594 = vmatpush.bf16.msrb.mxu3 %v585_v5  ;;  %668 = vmatpush.bf16.msrb.mxu0 %v659_v9  ;;  %v252_v23 = vunpack.c.l.b16 %v1432_v19  ;;  %v253_v24 = vunpack.c.l.b16 %v1436_v21  ;;  %v254_v25 = vunpack.c.l.b16 %v1439_v22  ;;  %v1180_v26 = vld [vmem:[%s1414_s28 + $0x48] sm:$0xf]  ;;  %v1181_v27 = vld [vmem:[%s1414_s28 + $0x50] sm:$0xf]  ;;  %v1447_v28 = vld [vmem:[%s1414_s28] sm:$0xf] }
  0x14   : > { %v256_v29 = vpack.c.b16 %v250_v18, %v249_v17  ;;  %v247_v30 = vunpack.c.l.b16 %v1180_v26  ;;  %v248_v31 = vunpack.c.l.b16 %v1181_v27  ;;  %v1452_v32 = vld [vmem:[%s1414_s28 + $0x8] sm:$0xf]  ;;  %v183_v33 = vld [vmem:[%s1414_s28 + $0x4] sm:$0x1]  ;;  %v957_v34 = vsel %vm272_vm0, %v1279_v12, 0 }
  0x15   : > { %v257_v35 = vpack.c.b16 %v252_v23, %v251_v20  ;;  %v258_v36 = vpack.c.b16 %v254_v25, %v253_v24  ;;  %v373_v37 = vshrl.u32 %v1447_v28, 16  ;;  %v185_v38 = vld [vmem:[%s1414_s28 + $0xc] sm:$0x1]  ;;  %v837_v39 = vsel %vm272_vm0, %v1269_v13, 0  ;;  %v1284_v44 = vld [vmem:[%s1790_s1 + $0x10] sm:$0x3] }
  0x16   : > { %1215 = vmatmul.msk.bf16.vlgmr.msra.gmra.mxu1 %vm259_vm1, %v256_v29  ;;  %v255_v40 = vpack.c.b16 %v248_v31, %v247_v30  ;;  %v1468_v41 = vpack.c.b16 %v249_v17, %v248_v31  ;;  %v376_v42 = vshll.u32 %v1447_v28, 16  ;;  %v387_v43 = vshrl.u32 %v1452_v32, 16  ;;  %v1480_v51 = vld [vmem:[%s1414_s28 + $0x10] sm:$0xf]  ;;  %v1484_v54 = vld [vmem:[%s1414_s28 + $0x18] sm:$0xf] }
  0x17   : > { %1216 = vmatmul.msk.bf16.vlgmr.msra.gmra.mxu2 %vm259_vm1, %v257_v35  ;;  %1217 = vmatmul.msk.bf16.vlgmr.msra.gmra.mxu3 %vm259_vm1, %v258_v36  ;;  %v375_v45 = vrot.slane %v373_v37, 4  ;;  %v390_v46 = vshll.u32 %v1452_v32, 16  ;;  %vm370_vm3 = vsmask.f32 7440  ;;  %v382_v47 = vshll.u32 %v183_v33, 16 }
  0x18   : > { %1214 = vmatmul.msk.bf16.vlgmr.msra.gmra.mxu0 %vm259_vm1, %v255_v40  ;;  %v378_v48 = vrot.slane %v376_v42, 5  ;;  %v389_v49 = vrot.slane %v387_v43, 4  ;;  %v396_v50 = vshll.u32 %v185_v38, 16  ;;  %906 = vmatpush.bf16.msra.mxu2 %v897_v11  ;;  %v1030_v53 = vsel %vm272_vm0, %v1284_v44, 0  ;;  %vm1488_vm4 = vmor %vm369_vm2, %vm370_vm3  ;;  %v1230_v5 = vld [vmem:[%s1414_s28 + $0x90] sm:$0xf] }
  0x19   : > { %v392_v52 = vrot.slane %v390_v46, 5  ;;  %966 = vmatpush.bf16.msra.mxu3 %v957_v34  ;;  %846 = vmatpush.bf16.msra.mxu1 %v837_v39  ;;  %v384_v56 = vrot.slane %v382_v47, 5  ;;  %v401_v60 = vshrl.u32 %v1480_v51, 16  ;;  %v404_v62 = vshll.u32 %v1480_v51, 16  ;;  %v1292_v8 = vld [vmem:[%s1414_s28 + $0x94] sm:$0xf0] }
  0x1a   : > { %v379_v55 = vor.u32 %v378_v48, %v375_v45  ;;  %1039 = vmatpush.bf16.msra.mxu0 %v1030_v53  ;;  %v398_v59 = vrot.slane %v396_v50, 5  ;;  %v415_v63 = vshrl.u32 %v1484_v54, 16  ;;  %v418_v0 = vshll.u32 %v1484_v54, 16  ;;  %v1251_v9 = vld [vmem:[%s1414_s28 + $0xd8] sm:$0xf] }
  0x1b   : > { %v393_v58 = vor.u32 %v392_v52, %v389_v49  ;;  %v313_v2 = vunpack.c.l.b16 %v1447_v28  ;;  %v314_v3 = vunpack.c.l.b16 %v1452_v32  ;;  %v403_v10 = vrot.slane %v401_v60, 4  ;;  %v1296_v12 = vld [vmem:[%s1414_s28 + $0xdc] sm:$0xf0]  ;;  %v187_v26 = vld [vmem:[%s1414_s28 + $0x14] sm:$0x1] }
  0x1c   : > { %v380_v61 = vrot.slane %v379_v55, 4  ;;  %v406_v13 = vrot.slane %v404_v62, 5  ;;  %v417_v14 = vrot.slane %v415_v63, 4  ;;  %v420_v17 = vrot.slane %v418_v0, 5  ;;  %v189_v27 = vld [vmem:[%s1414_s28 + $0x1c] sm:$0x1] }
  0x1d   : > { %v394_v1 = vrot.slane %v393_v58, 4  ;;  %v321_v28 = vpack.c.b16 %v314_v3, %v313_v2  ;;  %v1231_v30 = vor.u32 %v1292_v8, %v1230_v5  ;;  %v1252_v31 = vor.u32 %v1296_v12, %v1251_v9  ;;  %v1518_v42 = vld [vmem:[%s1414_s28 + $0x20] sm:$0xf]  ;;  %v1521_v43 = vld [vmem:[%s1414_s28 + $0x28] sm:$0xf] }
  0x1e   : > { %v385_v4 = vsel %vm1488_vm4, %v380_v61, %v384_v56  ;;  %v407_v33 = vor.u32 %v406_v13, %v403_v10  ;;  %v410_v34 = vshll.u32 %v187_v26, 16  ;;  %v421_v35 = vor.u32 %v420_v17, %v417_v14  ;;  %v1234_v56 = vld [vmem:[%s1414_s28 + $0xa0] sm:$0xf]  ;;  %v1293_v58 = vld [vmem:[%s1414_s28 + $0xa4] sm:$0xf0] }
  0x1f   : > { %v399_v6 = vsel %vm1488_vm4, %v394_v1, %v398_v59  ;;  %v486_v7 = vunpack.c.l.b16 %v385_v4  ;;  %v424_v36 = vshll.u32 %v189_v27, 16  ;;  %v429_v44 = vshrl.u32 %v1518_v42, 16  ;;  %v1255_v59 = vld [vmem:[%s1414_s28 + $0xe8] sm:$0xf]  ;;  %v1297_v60 = vld [vmem:[%s1414_s28 + $0xec] sm:$0xf0] }
  0x20   : > { %v1505_v11 = vunpack.c.l.b16 %v399_v6  ;;  %v408_v37 = vrot.slane %v407_v33, 4  ;;  %v412_v38 = vrot.slane %v410_v34, 5  ;;  %v422_v39 = vrot.slane %v421_v35, 4  ;;  %v191_v1 = vld [vmem:[%s1414_s28 + $0x24] sm:$0x1] }
  0x21   : > { %v426_v40 = vrot.slane %v424_v36, 5  ;;  %v432_v45 = vshll.u32 %v1518_v42, 16  ;;  %v443_v48 = vshrl.u32 %v1521_v43, 16  ;;  %v446_v49 = vshll.u32 %v1521_v43, 16  ;;  %v193_v2 = vld [vmem:[%s1414_s28 + $0x2c] sm:$0x1] }
  0x22   : > { %v494_v29 = vpack.c.b16 %v1505_v11, %v486_v7  ;;  %v413_v46 = vsel %vm1488_vm4, %v408_v37, %v412_v38  ;;  %v315_v50 = vunpack.c.l.b16 %v1480_v51  ;;  %v316_v52 = vunpack.c.l.b16 %v1484_v54  ;;  %v1553_v13 = vld [vmem:[%s1414_s28 + $0x30] sm:$0xf]  ;;  %v1556_v14 = vld [vmem:[%s1414_s28 + $0x38] sm:$0xf]  ;;  %v1201_v54 = vld [vmem:[%s1414_s28 + $0xc0] sm:$0xf] }
  0x23   : > { %v427_v47 = vsel %vm1488_vm4, %v422_v39, %v426_v40  ;;  %v1533_v53 = vunpack.c.l.b16 %v413_v46  ;;  %v431_v61 = vrot.slane %v429_v44, 4  ;;  %v434_v62 = vrot.slane %v432_v45, 5  ;;  %v1199_v32 = vld [vmem:[%s1414_s28 + $0xb8] sm:$0xf]  ;;  %v1203_v15 = vld [vmem:[%s1414_s28 + $0xc8] sm:$0xf] }
  0x24   : > { %v1535_v55 = vunpack.c.l.b16 %v427_v47  ;;  %v445_v63 = vrot.slane %v443_v48, 4  ;;  %v448_v0 = vrot.slane %v446_v49, 5  ;;  %v322_v4 = vpack.c.b16 %v316_v52, %v315_v50  ;;  %v195_v47 = vld [vmem:[%s1414_s28 + $0x34] sm:$0x1]  ;;  %v197_v48 = vld [vmem:[%s1414_s28 + $0x3c] sm:$0x1] }
  0x25   : > { %v1235_v6 = vor.u32 %v1293_v58, %v1234_v56  ;;  %v1256_v7 = vor.u32 %v1297_v60, %v1255_v59  ;;  %v435_v8 = vor.u32 %v434_v62, %v431_v61  ;;  %v438_v9 = vshll.u32 %v191_v1, 16  ;;  %v1238_v49 = vld [vmem:[%s1414_s28 + $0xb0] sm:$0xf]  ;;  %v1294_v56 = vld [vmem:[%s1414_s28 + $0xb4] sm:$0xf0] }
  0x26   : > { %1218 = vmatmul.msk.bf16.vlgmr.msrb.gmra.mxu1 %vm259_vm1, %v321_v28  ;;  %v495_v5 = vpack.c.b16 %v1535_v55, %v1533_v53  ;;  %v449_v10 = vor.u32 %v448_v0, %v445_v63  ;;  %v452_v12 = vshll.u32 %v193_v2, 16  ;;  %v474_v33 = vshll.u32 %v1556_v14, 16  ;;  %v1259_v59 = vld [vmem:[%s1414_s28 + $0xf8] sm:$0xf]  ;;  %v1298_v60 = vld [vmem:[%s1414_s28 + $0xfc] sm:$0xf0] }
  0x27   : > { %1223 = vmatmul.msk.bf16.vlgmr.msrb.gmra.mxu2 %vm259_vm1, %v494_v29  ;;  %1244 = vmatmul.msk.bf16.vlgmr.msrb.gmra.mxu3 %vm259_vm1, %v1231_v30  ;;  %v436_v17 = vrot.slane %v435_v8, 4  ;;  %v440_v26 = vrot.slane %v438_v9, 5  ;;  %v457_v29 = vshrl.u32 %v1553_v13, 16  ;;  %v460_v30 = vshll.u32 %v1553_v13, 16  ;;  %v1189_v9 = vld [vmem:[%s1414_s28 + $0x90] sm:$0xf] }
  0x28   : > { %1265 = vmatmul.msk.bf16.vlgmr.msrb.gmra.mxu0 %vm259_vm1, %v1252_v31  ;;  %v450_v27 = vrot.slane %v449_v10, 4  ;;  %v454_v28 = vrot.slane %v452_v12, 5  ;;  %v471_v31 = vshrl.u32 %v1556_v14, 16  ;;  %v317_v36 = vunpack.c.l.b16 %v1518_v42  ;;  %v1191_v10 = vld [vmem:[%s1414_s28 + $0x98] sm:$0xf] }
  0x29   : > { %v441_v34 = vsel %vm1488_vm4, %v436_v17, %v440_v26  ;;  %v318_v37 = vunpack.c.l.b16 %v1521_v43  ;;  %v459_v38 = vrot.slane %v457_v29, 4  ;;  %v462_v39 = vrot.slane %v460_v30, 5 }
  0x2a   : > { %v455_v35 = vsel %vm1488_vm4, %v450_v27, %v454_v28  ;;  %v473_v40 = vrot.slane %v471_v31, 4  ;;  %v476_v44 = vrot.slane %v474_v33, 5  ;;  %v1569_v45 = vunpack.c.l.b16 %v441_v34 }
  0x2b   : > { %v1571_v46 = vunpack.c.l.b16 %v455_v35  ;;  %v323_v58 = vpack.c.b16 %v318_v37, %v317_v36  ;;  %v463_v61 = vor.u32 %v462_v39, %v459_v38  ;;  %v466_v62 = vshll.u32 %v195_v47, 16  ;;  %v1242_v35 = vld [vmem:[%s1414_s28 + $0xc0] sm:$0xf]  ;;  %v1295_v38 = vld [vmem:[%s1414_s28 + $0xc4] sm:$0xf0] }
  0x2c   : > { %v477_v63 = vor.u32 %v476_v44, %v473_v40  ;;  %v480_v0 = vshll.u32 %v197_v48, 16  ;;  %v1239_v2 = vor.u32 %v1294_v56, %v1238_v49  ;;  %v699_v26 = vshrl.u32 %v1189_v9, 16  ;;  %v1190_v48 = vld [vmem:[%s1414_s28 + $0x94] sm:$0x1]  ;;  %v1192_v49 = vld [vmem:[%s1414_s28 + $0x9c] sm:$0x1] }
  0x2d   : > { %v496_v1 = vpack.c.b16 %v1571_v46, %v1569_v45  ;;  %v702_v27 = vshll.u32 %v1189_v9, 16  ;;  %v713_v28 = vshrl.u32 %v1191_v10, 16  ;;  %v716_v29 = vshll.u32 %v1191_v10, 16  ;;  %v1263_v56 = vld [vmem:[%s1414_s28 + $0x108] sm:$0xf] }
  0x2e   : > { %v482_v8 = vrot.slane %v480_v0, 5  ;;  %v319_v30 = vunpack.c.l.b16 %v1553_v13  ;;  %v320_v31 = vunpack.c.l.b16 %v1556_v14  ;;  %v701_v39 = vrot.slane %v699_v26, 4 }
  0x2f   : > { %v704_v40 = vrot.slane %v702_v27, 5  ;;  %v715_v44 = vrot.slane %v713_v28, 4  ;;  %v718_v47 = vrot.slane %v716_v29, 5  ;;  %v783_v42 = vshrl.u32 %v1201_v54, 16 }
  0x31   : > { %v719_v0 = vor.u32 %v718_v47, %v715_v44  ;;  %v1194_v47 = vld [vmem:[%s1414_s28 + $0xa4] sm:$0x1] }
  0x36   : > { %1219 = vmatmul.msk.bf16.gmra.mxu1 %vm259_vm1, %v322_v4  ;;  %v1260_v4 = vor.u32 %v1298_v60, %v1259_v59  ;;  %v324_v59 = vpack.c.b16 %v320_v31, %v319_v30 }
  0x37   : > { %1224 = vmatmul.msk.bf16.gmra.mxu2 %vm259_vm1, %v495_v5  ;;  %1245 = vmatmul.msk.bf16.gmra.mxu3 %vm259_vm1, %v1235_v6  ;;  %v464_v5 = vrot.slane %v463_v61, 4  ;;  %v468_v6 = vrot.slane %v466_v62, 5  ;;  %v1243_v61 = vor.u32 %v1295_v38, %v1242_v35  ;;  %v705_v62 = vor.u32 %v704_v40, %v701_v39 }
  0x38   : > { %1266 = vmatmul.msk.bf16.gmra.mxu0 %vm259_vm1, %v1256_v7  ;;  %v478_v7 = vrot.slane %v477_v63, 4  ;;  %v708_v63 = vshll.u32 %v1190_v48, 16  ;;  %v1196_v48 = vld [vmem:[%s1414_s28 + $0xac] sm:$0x1] }
  0x39   : > { %v469_v12 = vsel %vm1488_vm4, %v464_v5, %v468_v6  ;;  %v1195_v5 = vld [vmem:[%s1414_s28 + $0xa8] sm:$0xf]  ;;  %v706_v6 = vrot.slane %v705_v62, 4  ;;  %v1013_v62 = vpack.c.b16 %v1533_v53, %v1505_v11  ;;  %v769_v53 = vshrl.u32 %v1199_v32, 16 }
  0x3a   : > { %v483_v17 = vsel %vm1488_vm4, %v478_v7, %v482_v8  ;;  %v1597_v33 = vunpack.c.l.b16 %v469_v12  ;;  %v710_v7 = vrot.slane %v708_v63, 5  ;;  %v720_v8 = vrot.slane %v719_v0, 4 }
  0x3b   : > { %v1599_v34 = vunpack.c.l.b16 %v483_v17  ;;  %v741_v17 = vshrl.u32 %v1195_v5, 16  ;;  %v744_v26 = vshll.u32 %v1195_v5, 16  ;;  %v772_v5 = vshll.u32 %v1199_v32, 16 }
  0x3c   : > { %v711_v27 = vsel %vm1488_vm4, %v706_v6, %v710_v7 }
  0x3d   : > { %v497_v60 = vpack.c.b16 %v1599_v34, %v1597_v33  ;;  %v743_v38 = vrot.slane %v741_v17, 4  ;;  %v746_v39 = vrot.slane %v744_v26, 5  ;;  %v812_v40 = vunpack.c.l.b16 %v711_v27  ;;  %v1200_v17 = vld [vmem:[%s1414_s28 + $0xbc] sm:$0x1] }
  0x46   : > { %1220 = vmatmul.msk.bf16.gmra.mxu1 %vm259_vm1, %v323_v58  ;;  %v1299_v58 = vld [vmem:[%s1414_s28 + $0x10c] sm:$0xf0] }
  0x47   : > { %1225 = vmatmul.msk.bf16.gmra.mxu2 %vm259_vm1, %v496_v1  ;;  %1246 = vmatmul.msk.bf16.gmra.mxu3 %vm259_vm1, %v1239_v2  ;;  %v722_v1 = vshll.u32 %v1192_v49, 16  ;;  %v1264_v2 = vor.u32 %v1299_v58, %v1263_v56  ;;  %v736_v56 = vshll.u32 %v1194_v47, 16  ;;  %v747_v58 = vor.u32 %v746_v39, %v743_v38 }
  0x48   : > { %1267 = vmatmul.msk.bf16.gmra.mxu0 %vm259_vm1, %v1260_v4  ;;  %v1193_v4 = vld [vmem:[%s1414_s28 + $0xa0] sm:$0xf]  ;;  %v881_v38 = vpack.c.b16 %v317_v36, %v316_v52  ;;  %v941_v39 = vpack.c.b16 %v251_v20, %v250_v18  ;;  %v786_v52 = vshll.u32 %v1201_v54, 16  ;;  %v800_v36 = vshll.u32 %v1203_v15, 16 }
  0x49   : > { %v724_v9 = vrot.slane %v722_v1, 5  ;;  %v727_v10 = vshrl.u32 %v1193_v4, 16  ;;  %v730_v12 = vshll.u32 %v1193_v4, 16  ;;  %v738_v0 = vrot.slane %v736_v56, 5  ;;  %v1197_v4 = vld [vmem:[%s1414_s28 + $0xb0] sm:$0xf] }
  0x4a   : > { %v748_v1 = vrot.slane %v747_v58, 4  ;;  %v755_v11 = vshrl.u32 %v1197_v4, 16  ;;  %v198_v20 = vld [vmem:[%s1414_s28 + $0x40] sm:$0xf] }
  0x4b   : > { %v725_v28 = vsel %vm1488_vm4, %v720_v8, %v724_v9  ;;  %v729_v29 = vrot.slane %v727_v10, 4  ;;  %v732_v35 = vrot.slane %v730_v12, 5  ;;  %v771_v9 = vrot.slane %v769_v53, 4  ;;  %v1198_v12 = vld [vmem:[%s1414_s28 + $0xb4] sm:$0x1] }
  0x4c   : > { %v813_v44 = vunpack.c.l.b16 %v725_v28  ;;  %v757_v8 = vrot.slane %v755_v11, 4  ;;  %v774_v10 = vrot.slane %v772_v5, 5  ;;  %v764_v28 = vshll.u32 %v1198_v12, 16  ;;  %v199_v11 = vld [vmem:[%s1414_s28 + $0x44] sm:$0x1] }
  0x4d   : > { %v733_v49 = vor.u32 %v732_v35, %v729_v29  ;;  %v778_v35 = vshll.u32 %v1200_v17, 16  ;;  %v1000_v56 = vshll.u32 %v198_v20, 16  ;;  %v879_v12 = vunpack.c.l.b16 %v198_v20 }
  0x4e   : > { %v775_v29 = vor.u32 %v774_v10, %v771_v9  ;;  %v766_v47 = vrot.slane %v764_v28, 5 }
  0x4f   : > { %v734_v63 = vrot.slane %v733_v49, 4  ;;  %v780_v49 = vrot.slane %v778_v35, 5 }
  0x51   : > { %v739_v51 = vsel %vm1488_vm4, %v734_v63, %v738_v0  ;;  %v802_v63 = vrot.slane %v800_v36, 5  ;;  %v1202_v0 = vld [vmem:[%s1414_s28 + $0xc4] sm:$0x1] }
  0x52   : > { %v814_v6 = vunpack.c.l.b16 %v739_v51  ;;  %v882_v51 = vpack.c.b16 %v319_v30, %v318_v37  ;;  %v792_v53 = vshll.u32 %v1202_v0, 16  ;;  %v1188_v30 = vld [vmem:[%s1414_s28 + $0x88] sm:$0xf] }
  0x53   : > { %v939_v17 = vunpack.c.l.b16 %v1188_v30 }
  0x54   : > { %v794_v21 = vrot.slane %v792_v53, 5 }
  0x55   : > { %v943_v35 = vpack.c.b16 %v939_v17, %v254_v25 }
  0x56   : > { %1221 = vmatmul.msk.bf16.gmra.mxu1 %vm259_vm1, %v324_v59  ;;  %v750_v59 = vshll.u32 %v1196_v48, 16  ;;  %v776_v48 = vrot.slane %v775_v29, 4  ;;  %v883_v29 = vpack.c.b16 %v879_v12, %v320_v31 }
  0x57   : > { %1226 = vmatmul.msk.bf16.gmra.mxu2 %vm259_vm1, %v497_v60  ;;  %1247 = vmatmul.msk.bf16.gmra.mxu3 %vm259_vm1, %v1243_v61  ;;  %v820_v60 = vpack.c.b16 %v813_v44, %v812_v40  ;;  %v880_v61 = vpack.c.b16 %v315_v50, %v314_v3  ;;  %v758_v50 = vshll.u32 %v1197_v4, 16  ;;  %v1014_v40 = vpack.c.b16 %v1569_v45, %v1535_v55 }
  0x58   : > { %1268 = vmatmul.msk.bf16.gmra.mxu0 %vm259_vm1, %v1264_v2  ;;  %v752_v2 = vrot.slane %v750_v59, 5  ;;  %v781_v18 = vsel %vm1488_vm4, %v776_v48, %v780_v49  ;;  %v797_v55 = vshrl.u32 %v1203_v15, 16  ;;  %v997_v45 = vshrl.u32 %v198_v20, 16 }
  0x59   : > { %v817_v59 = vunpack.c.l.b16 %v781_v18  ;;  %v1002_v4 = vrot.slane %v1000_v56, 5 }
  0x5a   : > { %v753_v3 = vsel %vm1488_vm4, %v748_v1, %v752_v2  ;;  %v1204_v1 = vld [vmem:[%s1414_s28 + $0xcc] sm:$0x1]  ;;  %v999_v2 = vrot.slane %v997_v45, 4 }
  0x5b   : > { %v815_v7 = vunpack.c.l.b16 %v753_v3  ;;  %v942_v3 = vpack.c.b16 %v253_v24, %v252_v23 }
  0x5d   : > { %v821_v26 = vpack.c.b16 %v815_v7, %v814_v6  ;;  %v806_v6 = vshll.u32 %v1204_v1, 16  ;;  %v1015_v7 = vpack.c.b16 %v1597_v33, %v1571_v46 }
  0x5f   : > { %v808_v24 = vrot.slane %v806_v6, 5 }
  0x66   : > { %1270 = vmatmul.msk.bf16.vlgmr.msra.gmra.mxu1 %vm259_vm1, %v820_v60  ;;  %v785_v60 = vrot.slane %v783_v42, 4 }
  0x67   : > { %1275 = vmatmul.msk.bf16.vlgmr.msra.gmra.mxu2 %vm259_vm1, %v880_v61  ;;  %1280 = vmatmul.msk.bf16.vlgmr.msra.gmra.mxu3 %vm259_vm1, %v1468_v41  ;;  %v760_v41 = vrot.slane %v758_v50, 5  ;;  %v788_v61 = vrot.slane %v786_v52, 5 }
  0x68   : > { %1285 = vmatmul.msk.bf16.vlgmr.msra.gmra.mxu0 %vm259_vm1, %v1013_v62  ;;  %v799_v62 = vrot.slane %v797_v55, 4 }
  0x69   : > { %v761_v27 = vor.u32 %v760_v41, %v757_v8  ;;  %v789_v50 = vor.u32 %v788_v61, %v785_v60  ;;  %v1003_v8 = vor.u32 %v1002_v4, %v999_v2  ;;  %v1006_v41 = vshll.u32 %v199_v11, 16 }
  0x6a   : > { %v803_v5 = vor.u32 %v802_v63, %v799_v62 }
  0x6b   : > { %v762_v44 = vrot.slane %v761_v27, 4  ;;  %v790_v19 = vrot.slane %v789_v50, 4  ;;  %v1004_v43 = vrot.slane %v1003_v8, 4  ;;  %v1008_v13 = vrot.slane %v1006_v41, 5 }
  0x6c   : > { %v804_v23 = vrot.slane %v803_v5, 4 }
  0x6d   : > { %v767_v16 = vsel %vm1488_vm4, %v762_v44, %v766_v47  ;;  %v795_v37 = vsel %vm1488_vm4, %v790_v19, %v794_v21  ;;  %v1009_v33 = vsel %vm1488_vm4, %v1004_v43, %v1008_v13 }
  0x6e   : > { %v816_v58 = vunpack.c.l.b16 %v767_v16  ;;  %v809_v46 = vsel %vm1488_vm4, %v804_v23, %v808_v24  ;;  %v818_v9 = vunpack.c.l.b16 %v795_v37 }
  0x6f   : > { %v819_v10 = vunpack.c.l.b16 %v809_v46 }
  0x70   : > { %v822_v32 = vpack.c.b16 %v817_v59, %v816_v58 }
  0x71   : > { %v823_v27 = vpack.c.b16 %v819_v10, %v818_v9 }
  0x76   : > { %1271 = vmatmul.msk.bf16.gmra.mxu1 %vm259_vm1, %v821_v26  ;;  %v1012_v26 = vunpack.c.l.b16 %v1009_v33 }
  0x77   : > { %1276 = vmatmul.msk.bf16.gmra.mxu2 %vm259_vm1, %v881_v38  ;;  %1281 = vmatmul.msk.bf16.gmra.mxu3 %vm259_vm1, %v941_v39 }
  0x78   : > { %1286 = vmatmul.msk.bf16.gmra.mxu0 %vm259_vm1, %v1014_v40  ;;  %v1016_v38 = vpack.c.b16 %v1012_v26, %v1599_v34 }
  0x86   : > { %1272 = vmatmul.msk.bf16.gmra.mxu1 %vm259_vm1, %v822_v32 }
  0x87   : > { %1277 = vmatmul.msk.bf16.gmra.mxu2 %vm259_vm1, %v882_v51  ;;  %1282 = vmatmul.msk.bf16.gmra.mxu3 %vm259_vm1, %v942_v3 }
  0x88   : > { %1287 = vmatmul.msk.bf16.gmra.mxu0 %vm259_vm1, %v1015_v7 }
  0x93   : > { %v290_v28 = vpop.f32.mrf.mxu1 }
  0x95   : > { %v285_v39 = vpop.f32.mrf.mxu0 }
  0x96   : > { %1273 = vmatmul.msk.bf16.gmra.mxu1 %vm259_vm1, %v823_v27 }
  0x97   : > { %1278 = vmatmul.msk.bf16.gmra.mxu2 %vm259_vm1, %v883_v29  ;;  %1283 = vmatmul.msk.bf16.gmra.mxu3 %vm259_vm1, %v943_v35 }
  0x98   : > { %1288 = vmatmul.msk.bf16.gmra.mxu0 %vm259_vm1, %v1016_v38 }
  0x9a   : > { %v1698_v57 = vpop.f32.mrf.mxu2  ;;  %v1700_v40 = vpop.f32.mrf.mxu3 }
  0x9b   : > { %v1702_v14 = vpop.f32.mrf.mxu1 }
  0x9d   : > { %v287_v31 = vpop.f32.mrf.mxu0 }
  0xa2   : > { %v1704_v22 = vpop.f32.mrf.mxu2  ;;  %v1706_v25 = vpop.f32.mrf.mxu3 }
  0xa3   : > { %v349_v34 = vpop.f32.mrf.mxu1 }
  0xa4   : > { %v350_v11 = vadd.f32 %v349_v34, %v285_v39 }
  0xa5   : > { %v670_v44 = vpop.f32.mrf.mxu0 }
  0xaa   : > { %v522_v47 = vpop.f32.mrf.mxu2  ;;  %v596_v48 = vpop.f32.mrf.mxu3 }
  0xab   : > { %v351_v49 = vpop.f32.mrf.mxu1  ;;  %v542_v53 = vadd.f32 %v522_v47, %v350_v11 }
  0xac   : > { %v352_v41 = vadd.f32 %v351_v49, %v287_v31 }
  0xad   : > { %v672_v54 = vpop.f32.mrf.mxu0  ;;  %v616_v7 = vadd.f32 %v596_v48, %v542_v53 }
  0xaf   : > { %v690_v23 = vadd.f32 %v670_v44, %v616_v7 }
  0xb2   : > { %v524_v15 = vpop.f32.mrf.mxu2  ;;  %v598_v16 = vpop.f32.mrf.mxu3 }
  0xb3   : > { %v354_v18 = vpop.f32.mrf.mxu1  ;;  %v543_v21 = vadd.f32 %v524_v15, %v352_v41 }
  0xb4   : > { %v355_v33 = vadd.f32 %v354_v18, %v290_v28 }
  0xb5   : > { %v675_v20 = vpop.f32.mrf.mxu0  ;;  %v617_v37 = vadd.f32 %v598_v16, %v543_v21 }
  0xb7   : > { %v691_v26 = vadd.f32 %v672_v54, %v617_v37 }
  0xba   : > { %v527_v42 = vpop.f32.mrf.mxu2  ;;  %v601_v52 = vpop.f32.mrf.mxu3 }
  0xbb   : > { %v356_v55 = vpop.f32.mrf.mxu1  ;;  %v544_v12 = vadd.f32 %v527_v42, %v355_v33 }
  0xbc   : > { %v357_v31 = vadd.f32 %v356_v55, %v1702_v14 }
  0xbd   : > { %v1708_v36 = vpop.f32.mrf.mxu0  ;;  %v618_v38 = vadd.f32 %v601_v52, %v544_v12 }
  0xbf   : > { %v692_v49 = vadd.f32 %v675_v20, %v618_v38 }
  0xc2   : > { %v529_v45 = vpop.f32.mrf.mxu2  ;;  %v603_v56 = vpop.f32.mrf.mxu3 }
  0xc3   : > { %v359_v58 = vpop.f32.mrf.mxu1  ;;  %v545_v47 = vadd.f32 %v529_v45, %v357_v31 }
  0xc4   : > { %v360_v52 = vadd.f32 %v359_v58, %v1698_v57 }
  0xc5   : > { %v1710_v59 = vpop.f32.mrf.mxu0  ;;  %v619_v18 = vadd.f32 %v603_v56, %v545_v47 }
  0xc7   : > { %v693_v55 = vadd.f32 %v1708_v36, %v619_v18 }
  0xca   : > { %v532_v60 = vpop.f32.mrf.mxu2  ;;  %v1712_v61 = vpop.f32.mrf.mxu3 }
  0xcb   : > { %v1714_v62 = vpop.f32.mrf.mxu1 }
  0xcd   : > { %v1716_v63 = vpop.f32.mrf.mxu0 }
  0xd2   : > { %v1718_v0 = vpop.f32.mrf.mxu2  ;;  %v1720_v1 = vpop.f32.mrf.mxu3 }
  0xd3   : > { %v1722_v2 = vpop.f32.mrf.mxu1 }
  0xd5   : > { %v1724_v4 = vpop.f32.mrf.mxu0 }
  0xda   : > { %v1726_v32 = vpop.f32.mrf.mxu2  ;;  %v1728_v51 = vpop.f32.mrf.mxu3 }
  0xdb   : > { %v1730_v3 = vpop.f32.mrf.mxu1 }
  0xdd   : > { %v1732_v50 = vpop.f32.mrf.mxu0 }
  0xe2   : > { %v1734_v5 = vpop.f32.mrf.mxu2  ;;  %v1736_v6 = vpop.f32.mrf.mxu3 }
  0xe3   : > { %v848_v8 = vpop.f32.mrf.mxu1 }
  0xe4   : > { %v868_v24 = vadd.f32 %v848_v8, %v690_v23  ;;  %v546_v8 = vadd.f32 %v532_v60, %v360_v52  ;;  %v362_v23 = vadd.f32 %v1714_v62, %v1704_v22  ;;  %v365_v22 = vadd.f32 %v1722_v2, %v1700_v40 }
  0xe5   : > { %v1041_v19 = vpop.f32.mrf.mxu0  ;;  %v367_v40 = vadd.f32 %v1730_v3, %v1706_v25 }
  0xe6   : > { %v547_v58 = vadd.f32 %v1718_v0, %v362_v23  ;;  %v548_v0 = vadd.f32 %v1726_v32, %v365_v22 }
  0xe7   : > { %v549_v32 = vadd.f32 %v1734_v5, %v367_v40 }
  0xea   : > { %v908_v43 = vpop.f32.mrf.mxu2  ;;  %v968_v13 = vpop.f32.mrf.mxu3 }
  0xeb   : > { %v928_v46 = vadd.f32 %v908_v43, %v868_v24  ;;  %v850_v30 = vpop.f32.mrf.mxu1 }
  0xec   : > { %v869_v27 = vadd.f32 %v850_v30, %v691_v26 }
  0xed   : > { %v988_v9 = vadd.f32 %v968_v13, %v928_v46  ;;  %v1043_v10 = vpop.f32.mrf.mxu0 }
  0xef   : > { %v1061_v17 = vadd.f32 %v1041_v19, %v988_v9  ;;  %v620_v19 = vadd.f32 %v1712_v61, %v546_v8  ;;  %v621_v61 = vadd.f32 %v1720_v1, %v547_v58  ;;  %v622_v1 = vadd.f32 %v1728_v51, %v548_v0 }
  0xf0   : > { %v623_v51 = vadd.f32 %v1736_v6, %v549_v32 }
  0xf1   : > { %1070 = vst.msk [vmem:[%s1742_s14] sm:$0xff] %vm1069_vm5, %v1061_v17  ;;  %v694_v24 = vadd.f32 %v1710_v59, %v620_v19  ;;  %v695_v59 = vadd.f32 %v1716_v63, %v621_v61  ;;  %v696_v63 = vadd.f32 %v1724_v4, %v622_v1 }
  0xf2   : > { %v910_v29 = vpop.f32.mrf.mxu2  ;;  %v970_v35 = vpop.f32.mrf.mxu3  ;;  %v697_v3 = vadd.f32 %v1732_v50, %v623_v51 }
  0xf3   : > { %v929_v28 = vadd.f32 %v910_v29, %v869_v27  ;;  %v853_v39 = vpop.f32.mrf.mxu1 }
  0xf4   : > { %v870_v15 = vadd.f32 %v853_v39, %v692_v49 }
  0xf5   : > { %v989_v34 = vadd.f32 %v970_v35, %v929_v28  ;;  %v1046_v44 = vpop.f32.mrf.mxu0 }
  0xf7   : > { %v1062_v48 = vadd.f32 %v1043_v10, %v989_v34 }
  0xf9   : > { %1071 = vst.msk [vmem:[%s1742_s14 + $0x8] sm:$0xff] %vm1069_vm5, %v1062_v48 }
  0xfa   : > { %v913_v54 = vpop.f32.mrf.mxu2  ;;  %v973_v16 = vpop.f32.mrf.mxu3 }
  0xfb   : > { %v930_v42 = vadd.f32 %v913_v54, %v870_v15  ;;  %v855_v11 = vpop.f32.mrf.mxu1 }
  0xfc   : > { %v871_v20 = vadd.f32 %v855_v11, %v693_v55 }
  0xfd   : > { %v990_v53 = vadd.f32 %v973_v16, %v930_v42  ;;  %v1048_v7 = vpop.f32.mrf.mxu0 }
  0xff   : > { %v1063_v14 = vadd.f32 %v1046_v44, %v990_v53 }
 0x101   : > { %1072 = vst.msk [vmem:[%s1742_s14 + $0x10] sm:$0xff] %vm1069_vm5, %v1063_v14 }
 0x102   : > { %v915_v45 = vpop.f32.mrf.mxu2  ;;  %v975_v41 = vpop.f32.mrf.mxu3 }
 0x103   : > { %v931_v21 = vadd.f32 %v915_v45, %v871_v20  ;;  %v858_v56 = vpop.f32.mrf.mxu1 }
 0x104   : > { %v872_v43 = vadd.f32 %v858_v56, %v694_v24 }
 0x105   : > { %v991_v57 = vadd.f32 %v975_v41, %v931_v21  ;;  %v1051_v36 = vpop.f32.mrf.mxu0 }
 0x107   : > { %v1064_v60 = vadd.f32 %v1048_v7, %v991_v57 }
 0x109   : > { %1073 = vst.msk [vmem:[%s1742_s14 + $0x18] sm:$0xff] %vm1069_vm5, %v1064_v60 }
 0x10a   : > { %v918_v13 = vpop.f32.mrf.mxu2  ;;  %v978_v37 = vpop.f32.mrf.mxu3 }
 0x10b   : > { %v932_v46 = vadd.f32 %v918_v13, %v872_v43  ;;  %v860_v30 = vpop.f32.mrf.mxu1 }
 0x10c   : > { %v873_v9 = vadd.f32 %v860_v30, %v695_v59 }
 0x10d   : > { %v992_v62 = vadd.f32 %v978_v37, %v932_v46  ;;  %v1053_v10 = vpop.f32.mrf.mxu0 }
 0x10f   : > { %v1065_v33 = vadd.f32 %v1051_v36, %v992_v62 }
 0x111   : > { %1074 = vst.msk [vmem:[%s1742_s14 + $0x20] sm:$0xff] %vm1069_vm5, %v1065_v33 }
 0x112   : > { %v920_v12 = vpop.f32.mrf.mxu2  ;;  %v980_v17 = vpop.f32.mrf.mxu3 }
 0x113   : > { %v933_v26 = vadd.f32 %v920_v12, %v873_v9  ;;  %v863_v27 = vpop.f32.mrf.mxu1 }
 0x114   : > { %v874_v35 = vadd.f32 %v863_v27, %v696_v63 }
 0x115   : > { %v993_v2 = vadd.f32 %v980_v17, %v933_v26  ;;  %v1056_v31 = vpop.f32.mrf.mxu0 }
 0x117   : > { %v1066_v29 = vadd.f32 %v1053_v10, %v993_v2 }
 0x119   : > { %1075 = vst.msk [vmem:[%s1742_s14 + $0x28] sm:$0xff] %vm1069_vm5, %v1066_v29 }
 0x11a   : > { %v923_v38 = vpop.f32.mrf.mxu2  ;;  %v983_v28 = vpop.f32.mrf.mxu3 }
 0x11b   : > { %v934_v39 = vadd.f32 %v923_v38, %v874_v35  ;;  %v865_v44 = vpop.f32.mrf.mxu1 }
 0x11c   : > { %v875_v5 = vadd.f32 %v865_v44, %v697_v3 }
 0x11d   : > { %v994_v34 = vadd.f32 %v983_v28, %v934_v39  ;;  %v1058_v15 = vpop.f32.mrf.mxu0 }
 0x11f   : > { %v1067_v25 = vadd.f32 %v1056_v31, %v994_v34 }
 0x121   : > { %1076 = vst.msk [vmem:[%s1742_s14 + $0x30] sm:$0xff] %vm1069_vm5, %v1067_v25 }
 0x122   : > { %v925_v47 = vpop.f32.mrf.mxu2  ;;  %v985_v48 = vpop.f32.mrf.mxu3 }
 0x123   : > { %v935_v4 = vadd.f32 %v925_v47, %v875_v5 }
 0x125   : > { %v995_v49 = vadd.f32 %v985_v48, %v935_v4 }
 0x127   : > { %v1068_v54 = vadd.f32 %v1058_v15, %v995_v49 }
 0x129   : > { %1077 = vst.msk [vmem:[%s1742_s14 + $0x38] sm:$0xff] %vm1069_vm5, %v1068_v54 }
 0x12a PF: > { %s12_s11 = sadd.s32 1, %s1350_s11   ;;  %s1794_s9 = smov %s1346_s10 }
 0x12b   : > { %p9_p5 = scmp.ge.s32.totalorder %s12_s11, 4   ;;  %s1795_s10 = smov %s1797_s12 }
 0x12d   :  { %11 = sbr.rel (!%p9_p5) target bundleno = 2 (0x2), region = 72 }

</bundles_post_ra>
